<compile_context>
chip_gen: v5e
topology: v5e:2x2
jax: 0.10.0
libtpu: 0.0.40
codegen_flags: <defaults>
</compile_context>

<pallas_src>
import jax
import jax.numpy as jnp
from jax.experimental import pallas as pl
from jax.experimental.pallas import tpu as pltpu


# ---------------------------------------------------------------------------
# Shared gate math (pre-activations z: (B, 5D) f32, layout i|f|g|o|sentinel)
# ---------------------------------------------------------------------------
def _gates_to_states(z, m_prev, D):
    # D is a multiple of 128 -> every slice is a lane-aligned vreg view.
    i_g = jax.nn.sigmoid(z[:, 0 * D:1 * D])
    f_g = jax.nn.sigmoid(z[:, 1 * D:2 * D])
    g_g = jnp.tanh(z[:, 2 * D:3 * D])
    o_g = jax.nn.sigmoid(z[:, 3 * D:4 * D])
    sent = jax.nn.sigmoid(z[:, 4 * D:5 * D])

    m_t = f_g * m_prev + i_g * g_g
    tanh_m = jnp.tanh(m_t)          # computed once, reused
    h_t = o_g * tanh_m
    s_t = sent * tanh_m
    return h_t, m_t, s_t


# ---------------------------------------------------------------------------
# Single-step kernel: one fused (B, IN+D) x (IN+D, 5D) matmul on the MXU.
# ---------------------------------------------------------------------------
def adaptive_lstm_step_kernel(x_ref, h_ref, m_ref, w_ref, b_ref, hms_ref):
    D = h_ref.shape[1]
    # Concatenate [x | h] along lanes (both 128-aligned) -> single MXU operand.
    xh = jnp.concatenate([x_ref[...], h_ref[...]], axis=1).astype(w_ref.dtype)
    z = (jnp.dot(xh, w_ref[...], preferred_element_type=jnp.float32)
         + b_ref[...])                                   # f32 accumulation + f32 bias
    m_prev = m_ref[...].astype(jnp.float32)
    h_t, m_t, s_t = _gates_to_states(z, m_prev, D)
    # One wide, lane-dense store: [h | m | s]  (B, 3D)
    hms_ref[...] = jnp.concatenate([h_t, m_t, s_t], axis=1).astype(hms_ref.dtype)


def adaptive_lstm_cell(x_t, states, prep):
    """One fused forward step. Returns (h_t, m_t, s_t)."""
    h_last, m_last = states
    B = x_t.shape[0]
    D = h_last.shape[1]

    vmem = pl.BlockSpec(memory_space=pltpu.MemorySpace.VMEM)
    hms = pl.pallas_call(
        adaptive_lstm_step_kernel,
        out_shape=jax.ShapeDtypeStruct((B, 3 * D), x_t.dtype),
        in_specs=[vmem] * 5,
        out_specs=vmem,
    )(x_t, h_last, m_last, prep["w_slab"], prep["b_slab"])
    return hms[:, :D], hms[:, D:2 * D], hms[:, 2 * D:]


# ---------------------------------------------------------------------------
# Sequence kernel: time loop as a grid axis. Weights resident in VMEM
# (constant index_map), h/m carried in VMEM scratch, x-path precomputed,
# single lane-dense (1, B, 3D) output store per step.
# ---------------------------------------------------------------------------
def adaptive_lstm_seq_kernel(pre_ref, wh_ref, h0_ref, m0_ref,
                             hms_out, h_scr, m_scr):
    t = pl.program_id(0)
    D = m0_ref.shape[1]

    @pl.when(t == 0)
    def _():
        h_scr[...] = h0_ref[...].astype(jnp.float32)
        m_scr[...] = m0_ref[...].astype(jnp.float32)

    h = h_scr[...]
    m = m_scr[...]
    # Only the recurrent (D, 5D) matmul happens per step; x-path is precomputed.
    z = pre_ref[0] + jnp.dot(h.astype(wh_ref.dtype), wh_ref[...],
                             preferred_element_type=jnp.float32)
    h_t, m_t, s_t = _gates_to_states(z, m, D)

    # Single wide store [h | m | s] -> one output DMA per step.
    hms_out[0] = jnp.concatenate([h_t, m_t, s_t], axis=1).astype(hms_out.dtype)
    h_scr[...] = h_t
    m_scr[...] = m_t


def adaptive_lstm_sequence(x_seq, h0, m0, prep):
    """Run the cell over a (T, B, IN) sequence in one pallas_call."""
    T, B, IN = x_seq.shape
    D = h0.shape[1]
    mdt = prep["w_h_slab"].dtype

    # x has no recurrent dependence: one big (T*B, IN) x (IN, 5D) matmul at full
    # MXU utilization, bias folded in here.
    pre = (jnp.dot(x_seq.reshape(T * B, IN).astype(mdt), prep["w_x_slab"],
                   preferred_element_type=jnp.float32)
           + prep["b_slab"]).reshape(T, B, 5 * D)

    hms = pl.pallas_call(
        adaptive_lstm_seq_kernel,
        out_shape=jax.ShapeDtypeStruct((T, B, 3 * D), x_seq.dtype),
        grid=(T,),
        in_specs=[pl.BlockSpec((1, B, 5 * D), lambda t: (t, 0, 0)),   # per-step x-path
                  pl.BlockSpec((D, 5 * D), lambda t: (0, 0)),         # resident weights
                  pl.BlockSpec((B, D), lambda t: (0, 0)),             # h0
                  pl.BlockSpec((B, D), lambda t: (0, 0))],            # m0
        out_specs=pl.BlockSpec((1, B, 3 * D), lambda t: (t, 0, 0)),
        scratch_shapes=[pltpu.VMEM((B, D), jnp.float32),              # h carry
                        pltpu.VMEM((B, D), jnp.float32)],             # m carry
        compiler_params=pltpu.CompilerParams(
            dimension_semantics=("arbitrary",)),                      # recurrence
    )(pre, prep["w_h_slab"], h0, m0)
    return hms[:, :, :D], hms[:, :, D:2 * D], hms[:, :, 2 * D:]


# ---------------------------------------------------------------------------
# One-time parameter preparation (hoisted out of the per-step call).
# ---------------------------------------------------------------------------
def prepare_params(params, matmul_dtype=jnp.float32):
    D = params["w_hh"].shape[1]
    # Fused weight slabs, gate order i|f|g|o|sentinel along the output dim.
    wx = jnp.concatenate([params["w_ih"].T, params["sent_wx"].T], axis=1)   # (IN, 5D)
    wh = jnp.concatenate([params["w_hh"].T, params["sent_wh"].T], axis=1)   # (D,  5D)
    b = jnp.concatenate([params["b_ih"] + params["b_hh"],
                         params["sent_bx"] + params["sent_bh"]]).reshape(1, 5 * D)
    return {
        "w_slab": jnp.concatenate([wx, wh], axis=0).astype(matmul_dtype),   # (IN+D, 5D)
        "w_x_slab": wx.astype(matmul_dtype),
        "w_h_slab": wh.astype(matmul_dtype),
        "b_slab": b.astype(jnp.float32),
    }


# ---------------------------------------------------------------------------
# Pure-JAX reference (PyTorch LSTMCell + Sentinel semantics)
# ---------------------------------------------------------------------------
def _reference_step(x_t, h_last, m_last, params):
    D = h_last.shape[1]
    gates = (x_t @ params["w_ih"].T + params["b_ih"]
             + h_last @ params["w_hh"].T + params["b_hh"])
    i_g = jax.nn.sigmoid(gates[:, 0 * D:1 * D])
    f_g = jax.nn.sigmoid(gates[:, 1 * D:2 * D])
    g_g = jnp.tanh(gates[:, 2 * D:3 * D])
    o_g = jax.nn.sigmoid(gates[:, 3 * D:4 * D])
    m_t = f_g * m_last + i_g * g_g
    h_t = o_g * jnp.tanh(m_t)
    g_t = jax.nn.sigmoid(x_t @ params["sent_wx"].T + params["sent_bx"]
                         + h_last @ params["sent_wh"].T + params["sent_bh"])
    s_t = g_t * jnp.tanh(m_t)
    return h_t, m_t, s_t


def _reference_sequence(x_seq, h0, m0, params):
    def step(carry, x_t):
        h, m = carry
        h_t, m_t, s_t = _reference_step(x_t, h, m, params)
        return (h_t, m_t), (h_t, m_t, s_t)
    _, (h_seq, m_seq, s_seq) = jax.lax.scan(step, (h0, m0), x_seq)
    return h_seq, m_seq, s_seq


def _init_params(key, input_size, decoder_dim, dtype=jnp.float32):
    ks = jax.random.split(key, 8)
    D, IN = decoder_dim, input_size

    def xavier(k, shape):
        fan_out, fan_in = shape
        bound = (6.0 / (fan_in + fan_out)) ** 0.5
        return jax.random.uniform(k, shape, dtype, -bound, bound)

    def uniform(k, shape, bound):
        return jax.random.uniform(k, shape, dtype, -bound, bound)

    lstm_bound = 1.0 / (D ** 0.5)
    return {
        # nn.LSTMCell default init: U(-1/sqrt(D), 1/sqrt(D))
        "w_ih": uniform(ks[0], (4 * D, IN), lstm_bound),
        "w_hh": uniform(ks[1], (4 * D, D), lstm_bound),
        "b_ih": uniform(ks[2], (4 * D,), lstm_bound),
        "b_hh": uniform(ks[3], (4 * D,), lstm_bound),
        # Sentinel: xavier_uniform weights, default Linear bias init
        "sent_wx": xavier(ks[4], (D, IN)),
        "sent_bx": uniform(ks[5], (D,), 1.0 / (IN ** 0.5)),
        "sent_wh": xavier(ks[6], (D, D)),
        "sent_bh": uniform(ks[7], (D,), 1.0 / (D ** 0.5)),
    }


if __name__ == "__main__":
    B = 8               # batch
    embed_dim = 64
    IN = 2 * embed_dim  # 128
    D = 128             # decoder_dim
    T = 6               # timesteps for the sequence variant

    key = jax.random.PRNGKey(0)
    kx, kh, km, kp, ks = jax.random.split(key, 5)
    x_t = jax.random.normal(kx, (B, IN), jnp.float32)
    h_last = jax.random.normal(kh, (B, D), jnp.float32)
    m_last = jax.random.normal(km, (B, D), jnp.float32)
    x_seq = jax.random.normal(ks, (T, B, IN), jnp.float32)
    params = _init_params(kp, IN, D)

    # --- single step, f32 matmul operands ---
    prep_f32 = prepare_params(params, matmul_dtype=jnp.float32)
    h_t, m_t, s_t = adaptive_lstm_cell(x_t, (h_last, m_last), prep_f32)
    jax.block_until_ready((h_t, m_t, s_t))
    h_r, m_r, s_r = _reference_step(x_t, h_last, m_last, params)
    assert jnp.allclose(h_t, h_r, atol=1e-4, rtol=1e-4)
    assert jnp.allclose(m_t, m_r, atol=1e-4, rtol=1e-4)
    assert jnp.allclose(s_t, s_r, atol=1e-4, rtol=1e-4)

    # --- single step, bf16 matmul operands (f32 accumulation & elementwise) ---
    prep_bf16 = prepare_params(params, matmul_dtype=jnp.bfloat16)
    h_b, m_b, s_b = adaptive_lstm_cell(x_t, (h_last, m_last), prep_bf16)
    jax.block_until_ready((h_b, m_b, s_b))
    assert jnp.allclose(h_b, h_r, atol=5e-2, rtol=5e-2)
    assert jnp.allclose(m_b, m_r, atol=5e-2, rtol=5e-2)
    assert jnp.allclose(s_b, s_r, atol=5e-2, rtol=5e-2)

    # --- full sequence in one pallas_call (weights resident, x-path precomputed) ---
    h_seq, m_seq, s_seq = adaptive_lstm_sequence(x_seq, h_last, m_last, prep_f32)
    jax.block_until_ready((h_seq, m_seq, s_seq))
    h_sr, m_sr, s_sr = _reference_sequence(x_seq, h_last, m_last, params)
    assert jnp.allclose(h_seq, h_sr, atol=2e-4, rtol=2e-4)
    assert jnp.allclose(m_seq, m_sr, atol=2e-4, rtol=2e-4)
    assert jnp.allclose(s_seq, s_sr, atol=2e-4, rtol=2e-4)

    print("KERNEL_OK")
</pallas_src>

<mosaic_0001>
module attributes {stable_mosaic.version = 11 : i64} {
  func.func @adaptive_lstm_step_kernel(%arg0: memref<8x128xf32, #tpu.memory_space<vmem>>, %arg1: memref<8x128xf32, #tpu.memory_space<vmem>>, %arg2: memref<8x128xf32, #tpu.memory_space<vmem>>, %arg3: memref<256x640xf32, #tpu.memory_space<vmem>>, %arg4: memref<1x640xf32, #tpu.memory_space<vmem>>, %arg5: memref<8x384xf32, #tpu.memory_space<vmem>>) attributes {dimension_semantics = [], scalar_prefetch = 0 : i64, scratch_operands = 0 : i64, tpu.core_type = #tpu.core_type<tc>} {
    %c0 = arith.constant 0 : index
    %c0_0 = arith.constant 0 : index
    %0 = vector.load %arg0[%c0, %c0_0] : memref<8x128xf32, #tpu.memory_space<vmem>>, vector<8x128xf32>
    %c0_1 = arith.constant 0 : index
    %c0_2 = arith.constant 0 : index
    %1 = vector.load %arg1[%c0_1, %c0_2] : memref<8x128xf32, #tpu.memory_space<vmem>>, vector<8x128xf32>
    %2 = tpu.concatenate %0, %1 in 1 : vector<8x128xf32>, vector<8x128xf32> -> vector<8x256xf32>
    %c0_3 = arith.constant 0 : index
    %c0_4 = arith.constant 0 : index
    %3 = vector.load %arg3[%c0_3, %c0_4] : memref<256x640xf32, #tpu.memory_space<vmem>>, vector<256x640xf32>
    %cst = arith.constant dense<0.000000e+00> : vector<8x640xf32>
    %4 = tpu.matmul %2, %3, %cst {dimension_numbers = #tpu.dot_dimension_numbers<[1], [0], [0], [1], [0, 0, 1, 1], [], []>} : vector<8x256xf32>, vector<256x640xf32>, vector<8x640xf32> -> vector<8x640xf32>
    %c0_5 = arith.constant 0 : index
    %c0_6 = arith.constant 0 : index
    %5 = vector.load %arg4[%c0_5, %c0_6] : memref<1x640xf32, #tpu.memory_space<vmem>>, vector<1x640xf32>
    %6 = vector.broadcast %5 : vector<1x640xf32> to vector<8x640xf32>
    %7 = arith.addf %4, %6 : vector<8x640xf32>
    %c0_7 = arith.constant 0 : index
    %c0_8 = arith.constant 0 : index
    %8 = vector.load %arg2[%c0_7, %c0_8] : memref<8x128xf32, #tpu.memory_space<vmem>>, vector<8x128xf32>
    %9 = vector.extract_strided_slice %7 {offsets = [0, 0], sizes = [8, 128], strides = [1, 1]} : vector<8x640xf32> to vector<8x128xf32>
    %10 = arith.negf %9 : vector<8x128xf32>
    %11 = math.exp %10 : vector<8x128xf32>
    %cst_9 = arith.constant 1.000000e+00 : f32
    %12 = vector.broadcast %cst_9 : f32 to vector<8x128xf32>
    %13 = arith.addf %12, %11 : vector<8x128xf32>
    %14 = arith.divf %12, %13 : vector<8x128xf32>
    %15 = vector.extract_strided_slice %7 {offsets = [0, 128], sizes = [8, 128], strides = [1, 1]} : vector<8x640xf32> to vector<8x128xf32>
    %16 = arith.negf %15 : vector<8x128xf32>
    %17 = math.exp %16 : vector<8x128xf32>
    %cst_10 = arith.constant 1.000000e+00 : f32
    %18 = vector.broadcast %cst_10 : f32 to vector<8x128xf32>
    %19 = arith.addf %18, %17 : vector<8x128xf32>
    %20 = arith.divf %18, %19 : vector<8x128xf32>
    %21 = vector.extract_strided_slice %7 {offsets = [0, 256], sizes = [8, 128], strides = [1, 1]} : vector<8x640xf32> to vector<8x128xf32>
    %22 = math.tanh %21 : vector<8x128xf32>
    %23 = vector.extract_strided_slice %7 {offsets = [0, 384], sizes = [8, 128], strides = [1, 1]} : vector<8x640xf32> to vector<8x128xf32>
    %24 = arith.negf %23 : vector<8x128xf32>
    %25 = math.exp %24 : vector<8x128xf32>
    %cst_11 = arith.constant 1.000000e+00 : f32
    %26 = vector.broadcast %cst_11 : f32 to vector<8x128xf32>
    %27 = arith.addf %26, %25 : vector<8x128xf32>
    %28 = arith.divf %26, %27 : vector<8x128xf32>
    %29 = vector.extract_strided_slice %7 {offsets = [0, 512], sizes = [8, 128], strides = [1, 1]} : vector<8x640xf32> to vector<8x128xf32>
    %30 = arith.negf %29 : vector<8x128xf32>
    %31 = math.exp %30 : vector<8x128xf32>
    %cst_12 = arith.constant 1.000000e+00 : f32
    %32 = vector.broadcast %cst_12 : f32 to vector<8x128xf32>
    %33 = arith.addf %32, %31 : vector<8x128xf32>
    %34 = arith.divf %32, %33 : vector<8x128xf32>
    %35 = arith.mulf %20, %8 : vector<8x128xf32>
    %36 = arith.mulf %14, %22 : vector<8x128xf32>
    %37 = arith.addf %35, %36 : vector<8x128xf32>
    %38 = math.tanh %37 : vector<8x128xf32>
    %39 = arith.mulf %28, %38 : vector<8x128xf32>
    %40 = arith.mulf %34, %38 : vector<8x128xf32>
    %41 = tpu.concatenate %39, %37, %40 in 1 : vector<8x128xf32>, vector<8x128xf32>, vector<8x128xf32> -> vector<8x384xf32>
    %c0_13 = arith.constant 0 : index
    %c0_14 = arith.constant 0 : index
    %42 = vector.load %arg5[%c0_13, %c0_14] : memref<8x384xf32, #tpu.memory_space<vmem>>, vector<8x384xf32>
    tpu.vector_store %arg5[%c0_13, %c0_14], %41 {strides = array<i32>} : memref<8x384xf32, #tpu.memory_space<vmem>>, vector<8x384xf32>,
    return
  }
}

</mosaic_0001>

<bundles_post_ra>
// kernel: tpu_custom_call.1
= control target key start
LH: loop header
LB: loop body
LE: loop exit
PB: predicated region body
PF: predicated region fallthrough
CT: control target
= control target key end

     0   :  { %10 = vsyncpa [#allocation3], 0  ;;  %s833_s0 = inlined_call_operand.hbm [shape: f32[8,128], index: 0, kind: input, shape index: {}]   ;;  %s834_s1 = inlined_call_operand.hbm [shape: f32[8,128], index: 1, kind: input, shape index: {}]   ;;  %s835_s2 = inlined_call_operand.hbm [shape: f32[8,128], index: 2, kind: input, shape index: {}]   ;;  %s836_s3 = inlined_call_operand.hbm [shape: f32[256,640], index: 3, kind: input, shape index: {}]   ;;  %s837_s4 = inlined_call_operand.hbm [shape: f32[1,640], index: 4, kind: input, shape index: {}]   ;;  %s838_s5 = inlined_call_operand.hbm [shape: f32[8,384], index: 5, kind: output, shape index: {}]  }
   0x1   :  { %11 = vsyncpa [#allocation6], 0 }
   0x2   :  { %12 = vsyncpa [#allocation9], 0  ;;  %s30_s20 = sshll.u32 %s834_s1, 4  ;;  %s31_s20 = int_to_ptr.hbm [resolvable:$true] %s30_s20 }
   0x3   :  { %13 = vsyncpa [#allocation4], 0  ;;  %s755_s21 = smov [#allocation5]   ;;  %s51_s25 = sshll.u32 %s836_s3, 4  ;;  %s52_s25 = int_to_ptr.hbm [resolvable:$true] %s51_s25 }
   0x4   :  { %s32_s22 = sshll.u32 %s755_s21, 4  ;;  %s756_s26 = smov [#allocation8]   ;;  %s33_s22 = int_to_ptr.vmem [resolvable:$true] %s32_s22 }
   0x5   :  { %35 = dma.hbm_to_vmem [thread:$0]  %s31_s20, 128, %s33_s22, [#allocation6]  }
   0x6   :  { %s53_s27 = sshll.u32 %s756_s26, 4  ;;  %s757_s28 = smov 640   ;;  %s54_s27 = int_to_ptr.vmem [resolvable:$true] %s53_s27 }
   0x7   :  { %s758_s29 = smov 40   ;;  %s19_s1 = sshll.u32 %s833_s0, 4  ;;  %s20_s1 = int_to_ptr.hbm [resolvable:$true] %s19_s1 }
   0x8   :  { %59 = dma.hbm_to_vmem [thread:$0]  %s52_s25, 20480, %s54_s27, [#allocation9], %s757_s28, %s757_s28, %s758_s29  }
   0x9   :  { %s759_s7 = smov [#allocation2]   ;;  %s41_s3 = sshll.u32 %s835_s2, 4  ;;  %s42_s3 = int_to_ptr.hbm [resolvable:$true] %s41_s3 }
   0xa   :  { %s21_s8 = sshll.u32 %s759_s7, 4  ;;  %s760_s11 = smov [#allocation7]   ;;  %s22_s8 = int_to_ptr.vmem [resolvable:$true] %s21_s8 }
   0xb   :  { %24 = dma.hbm_to_vmem [thread:$0]  %s20_s1, 128, %s22_s8, [#allocation3]  }
   0xc   :  { %s43_s12 = sshll.u32 %s760_s11, 4  ;;  %s65_s15 = sshll.u32 %s837_s4, 4  ;;  %s44_s12 = int_to_ptr.vmem [resolvable:$true] %s43_s12  ;;  %s66_s15 = int_to_ptr.hbm [resolvable:$true] %s65_s15 }
   0xd   :  { %46 = dma.hbm_to_vmem [thread:$0]  %s42_s3, 128, %s44_s12, [#allocation6]  }
   0xe   :  { %s761_s0 = smov [#allocation10]  }
   0xf   :  { %s67_s16 = sshll.u32 %s761_s0, 4  ;;  %s68_s16 = int_to_ptr.vmem [resolvable:$true] %s67_s16 }
  0x10   :  { %70 = dma.hbm_to_vmem [thread:$0]  %s66_s15, 80, %s68_s16, [#allocation9]  }
  0x11   :  { %747 = dma.done.wait [#allocation3], 128  }
  0x12   :  { %748 = vsyncadd [#allocation3], 4294967168 }
  0x13   :  { %749 = dma.done.wait [#allocation6], 256  }
  0x14   :  { %750 = vsyncadd [#allocation6], 4294967040 }
  0x15   :  { %751 = dma.done.wait [#allocation9], 20560  }
  0x16   :  { %752 = vsyncadd [#allocation9], 4294946736  ;;  %v168_v0 = vld [vmem:[#allocation8 + $0x258] sm:$0xff]  ;;  %v169_v1 = vld [vmem:[#allocation8 + $0x260] sm:$0xff]  ;;  %s762_s2 = smov [#allocation11]   ;;  %s559_s19 = sshll.u32 %s838_s5, 4  ;;  %s560_s19 = int_to_ptr.hbm [resolvable:$true] %s559_s19 }
  0x17   :  { %v163_v2 = vld [vmem:[#allocation8 + $0x230] sm:$0xff]  ;;  %265 = vmatpush.msra.mxu0 %v168_v0  ;;  %305 = vmatpush.msra.mxu2 %v169_v1  ;;  %v248_v3 = vld [vmem:[#allocation8 + $0x4d8] sm:$0xff]  ;;  %v249_v5 = vld [vmem:[#allocation8 + $0x4e0] sm:$0xff]  ;;  %s557_s4 = sshll.u32 %s762_s2, 4  ;;  %s558_s4 = int_to_ptr.vmem [resolvable:$true] %s557_s4 }
  0x18   :  { %v164_v4 = vld [vmem:[#allocation8 + $0x238] sm:$0xff]  ;;  %285 = vmatpush.msra.mxu1 %v248_v3  ;;  %325 = vmatpush.msra.mxu3 %v249_v5  ;;  %v158_v6 = vld [vmem:[#allocation8 + $0x208] sm:$0xff]  ;;  %v243_v7 = vld [vmem:[#allocation8 + $0x4b0] sm:$0xff] }
  0x19   :  { %v159_v8 = vld [vmem:[#allocation8 + $0x210] sm:$0xff]  ;;  %266 = vmatpush.msra.mxu0 %v163_v2  ;;  %306 = vmatpush.msra.mxu2 %v164_v4  ;;  %v244_v9 = vld [vmem:[#allocation8 + $0x4b8] sm:$0xff]  ;;  %v238_v10 = vld [vmem:[#allocation8 + $0x488] sm:$0xff] }
  0x1a   :  { %286 = vmatpush.msra.mxu1 %v243_v7  ;;  %326 = vmatpush.msra.mxu3 %v244_v9  ;;  %v153_v11 = vld [vmem:[#allocation8 + $0x1e0] sm:$0xff]  ;;  %v154_v12 = vld [vmem:[#allocation8 + $0x1e8] sm:$0xff]  ;;  %v239_v13 = vld [vmem:[#allocation8 + $0x490] sm:$0xff] }
  0x1b   :  { %267 = vmatpush.msra.mxu0 %v158_v6  ;;  %307 = vmatpush.msra.mxu2 %v159_v8  ;;  %v233_v14 = vld [vmem:[#allocation8 + $0x460] sm:$0xff]  ;;  %v234_v15 = vld [vmem:[#allocation8 + $0x468] sm:$0xff]  ;;  %v148_v16 = vld [vmem:[#allocation8 + $0x1b8] sm:$0xff] }
  0x1c   :  { %287 = vmatpush.msra.mxu1 %v238_v10  ;;  %327 = vmatpush.msra.mxu3 %v239_v13  ;;  %v149_v17 = vld [vmem:[#allocation8 + $0x1c0] sm:$0xff]  ;;  %v228_v18 = vld [vmem:[#allocation8 + $0x438] sm:$0xff]  ;;  %v143_v20 = vld [vmem:[#allocation8 + $0x190] sm:$0xff] }
  0x1d   :  { %268 = vmatpush.msra.mxu0 %v153_v11  ;;  %308 = vmatpush.msra.mxu2 %v154_v12  ;;  %v229_v19 = vld [vmem:[#allocation8 + $0x440] sm:$0xff]  ;;  %v144_v21 = vld [vmem:[#allocation8 + $0x198] sm:$0xff]  ;;  %v223_v22 = vld [vmem:[#allocation8 + $0x410] sm:$0xff] }
  0x1e   :  { %288 = vmatpush.msra.mxu1 %v233_v14  ;;  %328 = vmatpush.msra.mxu3 %v234_v15  ;;  %v224_v23 = vld [vmem:[#allocation8 + $0x418] sm:$0xff]  ;;  %v138_v24 = vld [vmem:[#allocation8 + $0x168] sm:$0xff]  ;;  %v139_v25 = vld [vmem:[#allocation8 + $0x170] sm:$0xff] }
  0x1f   :  { %269 = vmatpush.msra.mxu0 %v148_v16  ;;  %309 = vmatpush.msra.mxu2 %v149_v17  ;;  %v218_v26 = vld [vmem:[#allocation8 + $0x3e8] sm:$0xff]  ;;  %v219_v27 = vld [vmem:[#allocation8 + $0x3f0] sm:$0xff]  ;;  %v133_v28 = vld [vmem:[#allocation8 + $0x140] sm:$0xff] }
  0x20   :  { %289 = vmatpush.msra.mxu1 %v228_v18  ;;  %329 = vmatpush.msra.mxu3 %v229_v19  ;;  %v134_v29 = vld [vmem:[#allocation8 + $0x148] sm:$0xff]  ;;  %v213_v30 = vld [vmem:[#allocation8 + $0x3c0] sm:$0xff]  ;;  %v128_v32 = vld [vmem:[#allocation8 + $0x118] sm:$0xff] }
  0x21   :  { %270 = vmatpush.msra.mxu0 %v143_v20  ;;  %310 = vmatpush.msra.mxu2 %v144_v21  ;;  %v214_v31 = vld [vmem:[#allocation8 + $0x3c8] sm:$0xff]  ;;  %v129_v33 = vld [vmem:[#allocation8 + $0x120] sm:$0xff]  ;;  %v208_v34 = vld [vmem:[#allocation8 + $0x398] sm:$0xff] }
  0x22   :  { %290 = vmatpush.msra.mxu1 %v223_v22  ;;  %330 = vmatpush.msra.mxu3 %v224_v23  ;;  %v209_v35 = vld [vmem:[#allocation8 + $0x3a0] sm:$0xff]  ;;  %v123_v36 = vld [vmem:[#allocation8 + $0xf0] sm:$0xff]  ;;  %v124_v37 = vld [vmem:[#allocation8 + $0xf8] sm:$0xff] }
  0x23   :  { %271 = vmatpush.msra.mxu0 %v138_v24  ;;  %311 = vmatpush.msra.mxu2 %v139_v25  ;;  %v203_v38 = vld [vmem:[#allocation8 + $0x370] sm:$0xff]  ;;  %v204_v39 = vld [vmem:[#allocation8 + $0x378] sm:$0xff]  ;;  %v118_v40 = vld [vmem:[#allocation8 + $0xc8] sm:$0xff] }
  0x24   :  { %291 = vmatpush.msra.mxu1 %v218_v26  ;;  %331 = vmatpush.msra.mxu3 %v219_v27  ;;  %v119_v41 = vld [vmem:[#allocation8 + $0xd0] sm:$0xff]  ;;  %v198_v42 = vld [vmem:[#allocation8 + $0x348] sm:$0xff]  ;;  %v113_v44 = vld [vmem:[#allocation8 + $0xa0] sm:$0xff] }
  0x25   :  { %272 = vmatpush.msra.mxu0 %v133_v28  ;;  %312 = vmatpush.msra.mxu2 %v134_v29  ;;  %v199_v43 = vld [vmem:[#allocation8 + $0x350] sm:$0xff]  ;;  %v114_v45 = vld [vmem:[#allocation8 + $0xa8] sm:$0xff]  ;;  %v193_v46 = vld [vmem:[#allocation8 + $0x320] sm:$0xff] }
  0x26   :  { %292 = vmatpush.msra.mxu1 %v213_v30  ;;  %332 = vmatpush.msra.mxu3 %v214_v31  ;;  %v194_v47 = vld [vmem:[#allocation8 + $0x328] sm:$0xff]  ;;  %v108_v48 = vld [vmem:[#allocation8 + $0x78] sm:$0xff]  ;;  %v109_v49 = vld [vmem:[#allocation8 + $0x80] sm:$0xff] }
  0x27   :  { %273 = vmatpush.msra.mxu0 %v128_v32  ;;  %313 = vmatpush.msra.mxu2 %v129_v33  ;;  %v188_v50 = vld [vmem:[#allocation8 + $0x2f8] sm:$0xff]  ;;  %v189_v51 = vld [vmem:[#allocation8 + $0x300] sm:$0xff]  ;;  %v103_v52 = vld [vmem:[#allocation8 + $0x50] sm:$0xff] }
  0x28   :  { %293 = vmatpush.msra.mxu1 %v208_v34  ;;  %333 = vmatpush.msra.mxu3 %v209_v35  ;;  %v104_v53 = vld [vmem:[#allocation8 + $0x58] sm:$0xff]  ;;  %v183_v54 = vld [vmem:[#allocation8 + $0x2d0] sm:$0xff]  ;;  %v98_v56 = vld [vmem:[#allocation8 + $0x28] sm:$0xff] }
  0x29   :  { %274 = vmatpush.msra.mxu0 %v123_v36  ;;  %314 = vmatpush.msra.mxu2 %v124_v37  ;;  %v184_v55 = vld [vmem:[#allocation8 + $0x2d8] sm:$0xff]  ;;  %v99_v57 = vld [vmem:[#allocation8 + $0x30] sm:$0xff]  ;;  %v178_v58 = vld [vmem:[#allocation8 + $0x2a8] sm:$0xff] }
  0x2a   :  { %294 = vmatpush.msra.mxu1 %v203_v38  ;;  %334 = vmatpush.msra.mxu3 %v204_v39  ;;  %v179_v59 = vld [vmem:[#allocation8 + $0x2b0] sm:$0xff]  ;;  %v93_v60 = vld [vmem:[#allocation8] sm:$0xff]  ;;  %v94_v61 = vld [vmem:[#allocation8 + $0x8] sm:$0xff] }
  0x2b   :  { %275 = vmatpush.msra.mxu0 %v118_v40  ;;  %315 = vmatpush.msra.mxu2 %v119_v41  ;;  %v170_v62 = vld [vmem:[#allocation8 + $0x268] sm:$0xff]  ;;  %v171_v63 = vld [vmem:[#allocation8 + $0x270] sm:$0xff]  ;;  %v173_v0 = vld [vmem:[#allocation8 + $0x280] sm:$0xff] }
  0x2c   :  { %295 = vmatpush.msra.mxu1 %v198_v42  ;;  %335 = vmatpush.msra.mxu3 %v199_v43  ;;  %v174_v1 = vld [vmem:[#allocation8 + $0x288] sm:$0xff]  ;;  %v165_v2 = vld [vmem:[#allocation8 + $0x240] sm:$0xff]  ;;  %v251_v5 = vld [vmem:[#allocation8 + $0x4f0] sm:$0xff] }
  0x2d   :  { %276 = vmatpush.msra.mxu0 %v113_v44  ;;  %316 = vmatpush.msra.mxu2 %v114_v45  ;;  %v250_v3 = vld [vmem:[#allocation8 + $0x4e8] sm:$0xff]  ;;  %v160_v6 = vld [vmem:[#allocation8 + $0x218] sm:$0xff]  ;;  %v245_v7 = vld [vmem:[#allocation8 + $0x4c0] sm:$0xff] }
  0x2e   :  { %296 = vmatpush.msra.mxu1 %v193_v46  ;;  %336 = vmatpush.msra.mxu3 %v194_v47  ;;  %v166_v4 = vld [vmem:[#allocation8 + $0x248] sm:$0xff]  ;;  %v161_v8 = vld [vmem:[#allocation8 + $0x220] sm:$0xff]  ;;  %v155_v10 = vld [vmem:[#allocation8 + $0x1f0] sm:$0xff] }
  0x2f   :  { %277 = vmatpush.msra.mxu0 %v108_v48  ;;  %317 = vmatpush.msra.mxu2 %v109_v49  ;;  %v246_v9 = vld [vmem:[#allocation8 + $0x4c8] sm:$0xff]  ;;  %v240_v11 = vld [vmem:[#allocation8 + $0x498] sm:$0xff]  ;;  %v241_v13 = vld [vmem:[#allocation8 + $0x4a0] sm:$0xff] }
  0x30   :  { %297 = vmatpush.msra.mxu1 %v188_v50  ;;  %337 = vmatpush.msra.mxu3 %v189_v51  ;;  %v156_v12 = vld [vmem:[#allocation8 + $0x1f8] sm:$0xff]  ;;  %v150_v14 = vld [vmem:[#allocation8 + $0x1c8] sm:$0xff]  ;;  %v235_v15 = vld [vmem:[#allocation8 + $0x470] sm:$0xff] }
  0x31   :  { %278 = vmatpush.msra.mxu0 %v103_v52  ;;  %318 = vmatpush.msra.mxu2 %v104_v53  ;;  %v151_v16 = vld [vmem:[#allocation8 + $0x1d0] sm:$0xff]  ;;  %v236_v17 = vld [vmem:[#allocation8 + $0x478] sm:$0xff]  ;;  %v145_v18 = vld [vmem:[#allocation8 + $0x1a0] sm:$0xff] }
  0x32   :  { %298 = vmatpush.msra.mxu1 %v183_v54  ;;  %338 = vmatpush.msra.mxu3 %v184_v55  ;;  %v230_v19 = vld [vmem:[#allocation8 + $0x448] sm:$0xff]  ;;  %v231_v21 = vld [vmem:[#allocation8 + $0x450] sm:$0xff]  ;;  %v140_v23 = vld [vmem:[#allocation8 + $0x178] sm:$0xff] }
  0x33   :  { %279 = vmatpush.msra.mxu0 %v98_v56  ;;  %319 = vmatpush.msra.mxu2 %v99_v57  ;;  %v146_v20 = vld [vmem:[#allocation8 + $0x1a8] sm:$0xff]  ;;  %v225_v24 = vld [vmem:[#allocation8 + $0x420] sm:$0xff]  ;;  %v135_v27 = vld [vmem:[#allocation8 + $0x150] sm:$0xff] }
  0x34   :  { %299 = vmatpush.msra.mxu1 %v178_v58  ;;  %339 = vmatpush.msra.mxu3 %v179_v59  ;;  %v808_v22 = vld [vmem:[#allocation2] sm:$0xff]  ;;  %v141_v25 = vld [vmem:[#allocation8 + $0x180] sm:$0xff]  ;;  %v811_v28 = vld [vmem:[#allocation5] sm:$0xff] }
  0x35   :  { %280 = vmatpush.msra.mxu0 %v93_v60  ;;  %320 = vmatpush.msra.mxu2 %v94_v61  ;;  %v226_v26 = vld [vmem:[#allocation8 + $0x428] sm:$0xff]  ;;  %v220_v29 = vld [vmem:[#allocation8 + $0x3f8] sm:$0xff]  ;;  %v221_v31 = vld [vmem:[#allocation8 + $0x400] sm:$0xff] }
  0x36   :  { %300 = vmatpush.msra.mxu1 %v173_v0  ;;  %340 = vmatpush.msra.mxu3 %v174_v1  ;;  %v136_v30 = vld [vmem:[#allocation8 + $0x158] sm:$0xff]  ;;  %v130_v32 = vld [vmem:[#allocation8 + $0x128] sm:$0xff]  ;;  %v215_v33 = vld [vmem:[#allocation8 + $0x3d0] sm:$0xff] }
  0x37   :  { %345 = vmatpush.msrb.mxu0 %v170_v62  ;;  %385 = vmatpush.msrb.mxu2 %v171_v63  ;;  %v131_v34 = vld [vmem:[#allocation8 + $0x130] sm:$0xff]  ;;  %v216_v35 = vld [vmem:[#allocation8 + $0x3d8] sm:$0xff]  ;;  %v210_v36 = vld [vmem:[#allocation8 + $0x3a8] sm:$0xff] }
  0x38   :  { %365 = vmatpush.msrb.mxu1 %v250_v3  ;;  %405 = vmatpush.msrb.mxu3 %v251_v5  ;;  %v125_v37 = vld [vmem:[#allocation8 + $0x100] sm:$0xff]  ;;  %v126_v38 = vld [vmem:[#allocation8 + $0x108] sm:$0xff]  ;;  %v211_v39 = vld [vmem:[#allocation8 + $0x3b0] sm:$0xff] }
  0x39   :  { %346 = vmatpush.msrb.mxu0 %v165_v2  ;;  %386 = vmatpush.msrb.mxu2 %v166_v4  ;;  %v120_v40 = vld [vmem:[#allocation8 + $0xd8] sm:$0xff]  ;;  %v205_v41 = vld [vmem:[#allocation8 + $0x380] sm:$0xff]  ;;  %v206_v43 = vld [vmem:[#allocation8 + $0x388] sm:$0xff] }
  0x3a   :  { %366 = vmatpush.msrb.mxu1 %v245_v7  ;;  %406 = vmatpush.msrb.mxu3 %v246_v9  ;;  %v121_v42 = vld [vmem:[#allocation8 + $0xe0] sm:$0xff]  ;;  %v115_v44 = vld [vmem:[#allocation8 + $0xb0] sm:$0xff]  ;;  %v200_v45 = vld [vmem:[#allocation8 + $0x358] sm:$0xff] }
  0x3b   :  { %347 = vmatpush.msrb.mxu0 %v160_v6  ;;  %387 = vmatpush.msrb.mxu2 %v161_v8  ;;  %v116_v46 = vld [vmem:[#allocation8 + $0xb8] sm:$0xff]  ;;  %v201_v47 = vld [vmem:[#allocation8 + $0x360] sm:$0xff]  ;;  %v110_v48 = vld [vmem:[#allocation8 + $0x88] sm:$0xff] }
  0x3c   :  { %367 = vmatpush.msrb.mxu1 %v240_v11  ;;  %407 = vmatpush.msrb.mxu3 %v241_v13  ;;  %v195_v49 = vld [vmem:[#allocation8 + $0x330] sm:$0xff]  ;;  %v196_v51 = vld [vmem:[#allocation8 + $0x338] sm:$0xff]  ;;  %v105_v52 = vld [vmem:[#allocation8 + $0x60] sm:$0xff] }
  0x3d   :  { %348 = vmatpush.msrb.mxu0 %v155_v10  ;;  %388 = vmatpush.msrb.mxu2 %v156_v12  ;;  %v111_v50 = vld [vmem:[#allocation8 + $0x90] sm:$0xff]  ;;  %v190_v53 = vld [vmem:[#allocation8 + $0x308] sm:$0xff]  ;;  %v100_v56 = vld [vmem:[#allocation8 + $0x38] sm:$0xff] }
  0x3e   :  { %368 = vmatpush.msrb.mxu1 %v235_v15  ;;  %408 = vmatpush.msrb.mxu3 %v236_v17  ;;  %v106_v54 = vld [vmem:[#allocation8 + $0x68] sm:$0xff]  ;;  %v191_v55 = vld [vmem:[#allocation8 + $0x310] sm:$0xff]  ;;  %v185_v57 = vld [vmem:[#allocation8 + $0x2e0] sm:$0xff] }
  0x3f   :  { %349 = vmatpush.msrb.mxu0 %v150_v14  ;;  %389 = vmatpush.msrb.mxu2 %v151_v16  ;;  %v101_v58 = vld [vmem:[#allocation8 + $0x40] sm:$0xff]  ;;  %v186_v59 = vld [vmem:[#allocation8 + $0x2e8] sm:$0xff]  ;;  %v95_v60 = vld [vmem:[#allocation8 + $0x10] sm:$0xff] }
  0x40   :  { %369 = vmatpush.msrb.mxu1 %v230_v19  ;;  %409 = vmatpush.msrb.mxu3 %v231_v21  ;;  %v180_v61 = vld [vmem:[#allocation8 + $0x2b8] sm:$0xff]  ;;  %v181_v63 = vld [vmem:[#allocation8 + $0x2c0] sm:$0xff]  ;;  %v175_v1 = vld [vmem:[#allocation8 + $0x290] sm:$0xff] }
  0x41   :  { %350 = vmatpush.msrb.mxu0 %v145_v18  ;;  %390 = vmatpush.msrb.mxu2 %v146_v20  ;;  %v96_v62 = vld [vmem:[#allocation8 + $0x18] sm:$0xff]  ;;  %v167_v3 = vld [vmem:[#allocation8 + $0x250] sm:$0xff]  ;;  %v162_v5 = vld [vmem:[#allocation8 + $0x228] sm:$0xff] }
  0x42   :  { %321 = vmatmul.f32.vlgmr.msra.gmra.mxu2 %v808_v22  ;;  %370 = vmatpush.msrb.mxu1 %v225_v24  ;;  %v172_v0 = vld [vmem:[#allocation8 + $0x278] sm:$0xff]  ;;  %v247_v6 = vld [vmem:[#allocation8 + $0x4d0] sm:$0xff]  ;;  %v157_v7 = vld [vmem:[#allocation8 + $0x200] sm:$0xff] }
  0x43   :  { %351 = vmatpush.msrb.mxu0 %v140_v23  ;;  %391 = vmatpush.msrb.mxu2 %v141_v25  ;;  %v176_v2 = vld [vmem:[#allocation8 + $0x298] sm:$0xff]  ;;  %v242_v8 = vld [vmem:[#allocation8 + $0x4a8] sm:$0xff]  ;;  %v237_v10 = vld [vmem:[#allocation8 + $0x480] sm:$0xff] }
  0x44   :  { %410 = vmatpush.msrb.mxu3 %v226_v26  ;;  %371 = vmatpush.msrb.mxu1 %v220_v29  ;;  %v252_v4 = vld [vmem:[#allocation8 + $0x4f8] sm:$0xff]  ;;  %v147_v11 = vld [vmem:[#allocation8 + $0x1b0] sm:$0xff]  ;;  %v142_v13 = vld [vmem:[#allocation8 + $0x188] sm:$0xff] }
  0x45   :  { %352 = vmatpush.msrb.mxu0 %v135_v27  ;;  %341 = vmatmul.f32.vlgmr.msra.gmra.mxu3 %v811_v28  ;;  %v152_v9 = vld [vmem:[#allocation8 + $0x1d8] sm:$0xff]  ;;  %v227_v14 = vld [vmem:[#allocation8 + $0x430] sm:$0xff]  ;;  %v137_v15 = vld [vmem:[#allocation8 + $0x160] sm:$0xff] }
  0x46   :  { %392 = vmatpush.msrb.mxu2 %v136_v30  ;;  %411 = vmatpush.msrb.mxu3 %v221_v31  ;;  %v232_v12 = vld [vmem:[#allocation8 + $0x458] sm:$0xff]  ;;  %v222_v16 = vld [vmem:[#allocation8 + $0x408] sm:$0xff]  ;;  %v217_v18 = vld [vmem:[#allocation8 + $0x3e0] sm:$0xff] }
  0x47   :  { %353 = vmatpush.msrb.mxu0 %v130_v32  ;;  %372 = vmatpush.msrb.mxu1 %v215_v33  ;;  %v132_v17 = vld [vmem:[#allocation8 + $0x138] sm:$0xff]  ;;  %v127_v19 = vld [vmem:[#allocation8 + $0x110] sm:$0xff]  ;;  %v122_v21 = vld [vmem:[#allocation8 + $0xe8] sm:$0xff] }
  0x48   :  { %393 = vmatpush.msrb.mxu2 %v131_v34  ;;  %412 = vmatpush.msrb.mxu3 %v216_v35  ;;  %v212_v20 = vld [vmem:[#allocation8 + $0x3b8] sm:$0xff]  ;;  %v207_v23 = vld [vmem:[#allocation8 + $0x390] sm:$0xff]  ;;  %v117_v24 = vld [vmem:[#allocation8 + $0xc0] sm:$0xff] }
  0x49   :  { %281 = vmatmul.f32.vlgmr.msra.gmra.mxu0 %v808_v22  ;;  %373 = vmatpush.msrb.mxu1 %v210_v36  ;;  %v202_v25 = vld [vmem:[#allocation8 + $0x368] sm:$0xff]  ;;  %v112_v26 = vld [vmem:[#allocation8 + $0x98] sm:$0xff]  ;;  %v197_v27 = vld [vmem:[#allocation8 + $0x340] sm:$0xff] }
  0x4a   :  { %354 = vmatpush.msrb.mxu0 %v125_v37  ;;  %394 = vmatpush.msrb.mxu2 %v126_v38  ;;  %v107_v29 = vld [vmem:[#allocation8 + $0x70] sm:$0xff]  ;;  %v192_v30 = vld [vmem:[#allocation8 + $0x318] sm:$0xff]  ;;  %v102_v31 = vld [vmem:[#allocation8 + $0x48] sm:$0xff] }
  0x4b   :  { %413 = vmatpush.msrb.mxu3 %v211_v39  ;;  %301 = vmatmul.f32.vlgmr.msra.gmra.mxu1 %v811_v28  ;;  %v187_v32 = vld [vmem:[#allocation8 + $0x2f0] sm:$0xff]  ;;  %v97_v33 = vld [vmem:[#allocation8 + $0x20] sm:$0xff]  ;;  %v182_v34 = vld [vmem:[#allocation8 + $0x2c8] sm:$0xff] }
  0x4c   :  { %355 = vmatpush.msrb.mxu0 %v120_v40  ;;  %374 = vmatpush.msrb.mxu1 %v205_v41  ;;  %v177_v35 = vld [vmem:[#allocation8 + $0x2a0] sm:$0xff] }
  0x4d   :  { %395 = vmatpush.msrb.mxu2 %v121_v42  ;;  %414 = vmatpush.msrb.mxu3 %v206_v43  ;;  %v822_v36 = vld [vmem:[#allocation10] sm:$0x1f] }
  0x4e   :  { %356 = vmatpush.msrb.mxu0 %v115_v44  ;;  %375 = vmatpush.msrb.mxu1 %v200_v45  ;;  %v256_v37 = vperm.slane %v822_v36, 1  ;;  %v255_v38 = vperm.slane %v822_v36, 0 }
  0x4f   :  { %396 = vmatpush.msrb.mxu2 %v116_v46  ;;  %415 = vmatpush.msrb.mxu3 %v201_v47 }
  0x50   :  { %357 = vmatpush.msrb.mxu0 %v110_v48  ;;  %376 = vmatpush.msrb.mxu1 %v195_v49 }
  0x51   :  { %397 = vmatpush.msrb.mxu2 %v111_v50  ;;  %416 = vmatpush.msrb.mxu3 %v196_v51  ;;  %v257_v51 = vperm.slane %v822_v36, 2 }
  0x52   :  { %358 = vmatpush.msrb.mxu0 %v105_v52  ;;  %377 = vmatpush.msrb.mxu1 %v190_v53  ;;  %v258_v52 = vperm.slane %v822_v36, 3 }
  0x53   :  { %398 = vmatpush.msrb.mxu2 %v106_v54  ;;  %417 = vmatpush.msrb.mxu3 %v191_v55 }
  0x54   :  { %359 = vmatpush.msrb.mxu0 %v100_v56  ;;  %378 = vmatpush.msrb.mxu1 %v185_v57 }
  0x55   :  { %399 = vmatpush.msrb.mxu2 %v101_v58  ;;  %418 = vmatpush.msrb.mxu3 %v186_v59 }
  0x56   :  { %360 = vmatpush.msrb.mxu0 %v95_v60  ;;  %379 = vmatpush.msrb.mxu1 %v180_v61 }
  0x57   :  { %400 = vmatpush.msrb.mxu2 %v96_v62  ;;  %419 = vmatpush.msrb.mxu3 %v181_v63 }
  0x58   :  { %401 = vmatmul.f32.vlgmr.msrb.gmra.mxu2 %v808_v22  ;;  %425 = vmatpush.msra.mxu0 %v172_v0 }
  0x59   :  { %380 = vmatpush.msrb.mxu1 %v175_v1  ;;  %420 = vmatpush.msrb.mxu3 %v176_v2 }
  0x5a   :  { %421 = vmatmul.f32.vlgmr.msrb.gmra.mxu3 %v811_v28  ;;  %426 = vmatpush.msra.mxu0 %v167_v3 }
  0x5b   :  { %445 = vmatpush.msra.mxu1 %v252_v4  ;;  %361 = vmatmul.f32.vlgmr.msrb.gmra.mxu0 %v808_v22 }
  0x5c   :  { %427 = vmatpush.msra.mxu0 %v162_v5  ;;  %381 = vmatmul.f32.vlgmr.msrb.gmra.mxu1 %v811_v28 }
  0x5d   :  { %446 = vmatpush.msra.mxu1 %v247_v6 }
  0x5e   :  { %428 = vmatpush.msra.mxu0 %v157_v7 }
  0x5f   :  { %447 = vmatpush.msra.mxu1 %v242_v8 }
  0x60   :  { %429 = vmatpush.msra.mxu0 %v152_v9 }
  0x61   :  { %448 = vmatpush.msra.mxu1 %v237_v10 }
  0x62   :  { %430 = vmatpush.msra.mxu0 %v147_v11 }
  0x63   :  { %449 = vmatpush.msra.mxu1 %v232_v12 }
  0x64   :  { %431 = vmatpush.msra.mxu0 %v142_v13 }
  0x65   :  { %450 = vmatpush.msra.mxu1 %v227_v14 }
  0x66   :  { %432 = vmatpush.msra.mxu0 %v137_v15  ;;  %v465_v15 = vld [vmem:[#allocation7] sm:$0xff] }
  0x67   :  { %451 = vmatpush.msra.mxu1 %v222_v16 }
  0x68   :  { %433 = vmatpush.msra.mxu0 %v132_v17 }
  0x69   :  { %452 = vmatpush.msra.mxu1 %v217_v18 }
  0x6a   :  { %434 = vmatpush.msra.mxu0 %v127_v19 }
  0x6b   :  { %453 = vmatpush.msra.mxu1 %v212_v20 }
  0x6c   :  { %435 = vmatpush.msra.mxu0 %v122_v21 }
  0x6d   :  { %454 = vmatpush.msra.mxu1 %v207_v23 }
  0x6e   :  { %436 = vmatpush.msra.mxu0 %v117_v24 }
  0x6f   :  { %455 = vmatpush.msra.mxu1 %v202_v25 }
  0x70   :  { %437 = vmatpush.msra.mxu0 %v112_v26 }
  0x71   :  { %456 = vmatpush.msra.mxu1 %v197_v27  ;;  %v259_v27 = vperm.slane %v822_v36, 4 }
  0x72   :  { %438 = vmatpush.msra.mxu0 %v107_v29 }
  0x73   :  { %457 = vmatpush.msra.mxu1 %v192_v30 }
  0x74   :  { %439 = vmatpush.msra.mxu0 %v102_v31 }
  0x75   :  { %458 = vmatpush.msra.mxu1 %v187_v32 }
  0x76   :  { %440 = vmatpush.msra.mxu0 %v97_v33 }
  0x77   :  { %459 = vmatpush.msra.mxu1 %v182_v34  ;;  %441 = vmatmul.f32.vlgmr.msra.gmra.mxu0 %v808_v22 }
  0x79   :  { %460 = vmatpush.msra.mxu1 %v177_v35 }
  0x7a   :  { %461 = vmatmul.f32.vlgmr.msra.gmra.mxu1 %v811_v28 }
  0xc5   :  { %v322_v39 = vpop.f32.mrf.mxu2 }
  0xc6   :  { %v282_v40 = vpop.f32.mrf.mxu0  ;;  %v323_v41 = vadd.f32 %v322_v39, %v256_v37 }
  0xc7   :  { %v283_v42 = vadd.f32 %v282_v40, %v255_v38 }
  0xc8   :  { %v302_v43 = vpop.f32.mrf.mxu1  ;;  %v342_v44 = vpop.f32.mrf.mxu3 }
  0xc9   :  { %v303_v45 = vadd.f32 %v302_v43, %v283_v42  ;;  %v343_v46 = vadd.f32 %v342_v44, %v323_v41 }
  0xcb   :  { %v571_v47 = vmul.f32 -1.442695, %v303_v45  ;;  %v572_v48 = vmul.f32 -1.442695, %v343_v46 }
  0xcd   :  { %583 = vpow2.f32 %v571_v47 }
  0xce   :  { %585 = vpow2.f32 %v572_v48 }
  0xd3   :  { %v584_v22 = vpop.eup %583 }
  0xd4   :  { %v586_v28 = vpop.eup %585  ;;  %v469_v49 = vadd.f32 1.0, %v584_v22 }
  0xd5   :  { %v488_v50 = vadd.f32 1.0, %v586_v28 }
  0xd6   :  { %587 = vrcp.f32 %v469_v49  ;;  %vm475_vm0 = vweird.f32 %v469_v49  ;;  %v479_v63 = vand.u32 2147483647, %v469_v49  ;;  %v481_v2 = vand.u32 2147483648, %v469_v49 }
  0xd7   :  { %589 = vrcp.f32 %v488_v50  ;;  %vm494_vm1 = vweird.f32 %v488_v50  ;;  %v500_v4 = vand.u32 2147483648, %v488_v50  ;;  %v498_v7 = vand.u32 2147483647, %v488_v50 }
  0xd8   :  { %v362_v53 = vpop.f32.mrf.mxu0  ;;  %v482_v10 = vor.u32 1.1754944e-38, %v481_v2  ;;  %vm480_vm6 = vcmp.eq.f32.partialorder %v479_v63, 8.507059e+37 }
  0xd9   :  { %v363_v54 = vadd.f32 %v362_v53, %v257_v51  ;;  %v382_v55 = vpop.f32.mrf.mxu1  ;;  %v501_v11 = vor.u32 1.1754944e-38, %v500_v4  ;;  %vm499_vm7 = vcmp.eq.f32.partialorder %v498_v7, 8.507059e+37 }
  0xdb   :  { %v402_v56 = vpop.f32.mrf.mxu2  ;;  %v383_v57 = vadd.f32 %v382_v55, %v363_v54 }
  0xdc   :  { %v588_v58 = vpop.eup %587  ;;  %v403_v59 = vadd.f32 %v402_v56, %v258_v52 }
  0xdd   :  { %v590_v60 = vpop.eup %589  ;;  %v471_v61 = vmul.f32 %v588_v58, %v469_v49  ;;  %v422_v62 = vpop.f32.mrf.mxu3  ;;  %591 = vtanh.f32 %v383_v57  ;;  %vm476_vm2 = vweird.f32 %v588_v58 }
  0xde   :  { %v490_v0 = vmul.f32 %v590_v60, %v488_v50  ;;  %v423_v1 = vadd.f32 %v422_v62, %v403_v59  ;;  %vm495_vm3 = vweird.f32 %v590_v60  ;;  %vm477_vm4 = vmor %vm475_vm0, %vm476_vm2 }
  0xdf   :  { %v472_v3 = vsub.f32 1.0, %v471_v61  ;;  %vm496_vm5 = vmor %vm494_vm1, %vm495_vm3 }
  0xe0   :  { %v491_v5 = vsub.f32 1.0, %v490_v0  ;;  %v573_v6 = vmul.f32 -1.442695, %v423_v1 }
  0xe1   :  { %v473_v8 = vmul.f32 %v588_v58, %v472_v3 }
  0xe2   :  { %v492_v9 = vmul.f32 %v590_v60, %v491_v5  ;;  %593 = vpow2.f32 %v573_v6 }
  0xe3   :  { %v474_v12 = vadd.f32 %v588_v58, %v473_v8  ;;  %v592_v13 = vpop.eup %591 }
  0xe4   :  { %v493_v14 = vadd.f32 %v590_v60, %v492_v9 }
  0xe5   :  { %v478_v16 = vsel %vm477_vm4, %v588_v58, %v474_v12 }
  0xe6   :  { %v483_v17 = vsel %vm480_vm6, %v482_v10, %v478_v16  ;;  %v497_v18 = vsel %vm496_vm5, %v590_v60, %v493_v14 }
  0xe7   :  { %v502_v19 = vsel %vm499_vm7, %v501_v11, %v497_v18  ;;  %v544_v20 = vmul.f32 %v592_v13, %v483_v17 }
  0xe8   :  { %v594_v21 = vpop.eup %593  ;;  %v543_v23 = vmul.f32 %v502_v19, %v465_v15 }
  0xe9   :  { %v508_v24 = vadd.f32 1.0, %v594_v21 }
  0xea   :  { %v545_v25 = vadd.f32 %v544_v20, %v543_v23 }
  0xeb   :  { %595 = vrcp.f32 %v508_v24  ;;  %v520_v30 = vand.u32 2147483648, %v508_v24  ;;  %vm514_vm8 = vweird.f32 %v508_v24  ;;  %v518_v33 = vand.u32 2147483647, %v508_v24 }
  0xec   :  { %550 = vst [vmem:[#allocation11 + $0x8] sm:$0xff] %v545_v25  ;;  %597 = vtanh.f32 %v545_v25 }
  0xed   :  { %v521_v38 = vor.u32 1.1754944e-38, %v520_v30  ;;  %vm519_vm11 = vcmp.eq.f32.partialorder %v518_v33, 8.507059e+37 }
  0xf1   :  { %v596_v26 = vpop.eup %595 }
  0xf2   :  { %v510_v29 = vmul.f32 %v596_v26, %v508_v24  ;;  %vm515_vm9 = vweird.f32 %v596_v26  ;;  %v598_v43 = vpop.eup %597 }
  0xf3   :  { %vm516_vm10 = vmor %vm514_vm8, %vm515_vm9 }
  0xf4   :  { %v511_v31 = vsub.f32 1.0, %v510_v29  ;;  %v442_v32 = vpop.f32.mrf.mxu0 }
  0xf5   :  { %v443_v34 = vadd.f32 %v442_v32, %v259_v27 }
  0xf6   :  { %v512_v35 = vmul.f32 %v596_v26, %v511_v31 }
  0xf7   :  { %v462_v37 = vpop.f32.mrf.mxu1 }
  0xf8   :  { %v463_v39 = vadd.f32 %v462_v37, %v443_v34  ;;  %v513_v40 = vadd.f32 %v596_v26, %v512_v35 }
  0xfa   :  { %v574_v41 = vmul.f32 -1.442695, %v463_v39  ;;  %v517_v42 = vsel %vm516_vm10, %v596_v26, %v513_v40 }
  0xfb   :  { %v522_v36 = vsel %vm519_vm11, %v521_v38, %v517_v42 }
  0xfc   :  { %599 = vpow2.f32 %v574_v41  ;;  %v547_v44 = vmul.f32 %v598_v43, %v522_v36 }
  0xfe   :  { %549 = vst [vmem:[#allocation11] sm:$0xff] %v547_v44 }
 0x102   :  { %v600_v45 = vpop.eup %599 }
 0x103   :  { %v527_v46 = vadd.f32 1.0, %v600_v45 }
 0x105   :  { %601 = vrcp.f32 %v527_v46  ;;  %v539_v28 = vand.u32 2147483648, %v527_v46  ;;  %v537_v50 = vand.u32 2147483647, %v527_v46  ;;  %vm533_vm13 = vweird.f32 %v527_v46 }
 0x107   :  { %v540_v52 = vor.u32 1.1754944e-38, %v539_v28  ;;  %vm538_vm15 = vcmp.eq.f32.partialorder %v537_v50, 8.507059e+37 }
 0x10b   :  { %v602_v47 = vpop.eup %601 }
 0x10c   :  { %v529_v48 = vmul.f32 %v602_v47, %v527_v46  ;;  %vm534_vm12 = vweird.f32 %v602_v47 }
 0x10d   :  { %vm535_vm14 = vmor %vm533_vm13, %vm534_vm12 }
 0x10e   :  { %v530_v22 = vsub.f32 1.0, %v529_v48 }
 0x110   :  { %v531_v49 = vmul.f32 %v602_v47, %v530_v22 }
 0x112   :  { %v532_v51 = vadd.f32 %v602_v47, %v531_v49 }
 0x114   :  { %v536_v53 = vsel %vm535_vm14, %v602_v47, %v532_v51 }
 0x115   :  { %v541_v54 = vsel %vm538_vm15, %v540_v52, %v536_v53 }
 0x116   :  { %v548_v55 = vmul.f32 %v598_v43, %v541_v54 }
 0x118   :  { %551 = vst [vmem:[#allocation11 + $0x10] sm:$0xff] %v548_v55 }
 0x119   :  { %562 = dma.vmem_to_hbm [thread:$0]  %s558_s4, 384, %s560_s19, [#allocation4]  }
 0x11a   :  { %753 = dma.done.wait [#allocation4], 384  }
 0x11b   :  { %754 = vsyncadd [#allocation4], 4294966912 }
 0x11c   :  { %567 = vsyncpa [#allocation3], 1 }
 0x11d   :  { %568 = vsyncpa [#allocation6], 1 }
 0x11e   :  { %569 = vsyncpa [#allocation9], 1 }
 0x11f   :  { %570 = vsyncpa [#allocation4], 1 }

</bundles_post_ra>
